<compile_context>
chip_gen: v5e
topology: v5e:2x2
jax: 0.10.0
libtpu: 0.0.40
codegen_flags: <defaults>
</compile_context>

<pallas_src>
import functools

import jax
import jax.numpy as jnp
from jax.experimental import pallas as pl
from jax.experimental.pallas import tpu as pltpu

LN_EPS = 1e-5       # torch.nn.LayerNorm default
NEG_INF = -1e30     # finite mask value: no -inf special-casing / NaN hazard


def _layer_norm(x, gamma, beta):
    # one-pass variance (E[x^2] - mean^2), clamped >= 0, rsqrt on the EUP slot
    mean = jnp.mean(x, axis=-1, keepdims=True)
    var = jnp.maximum(jnp.mean(x * x, axis=-1, keepdims=True) - mean * mean, 0.0)
    return (x - mean) * jax.lax.rsqrt(var + LN_EPS) * gamma + beta


# -----------------------------------------------------------------------------
# Stage 1: input projection + LayerNorm + positional encoding (one program / b)
# -----------------------------------------------------------------------------
def _input_proj_kernel(x_ref, pe_ref, w_ref, vec_ref, o_ref):
    h = jnp.dot(x_ref[...].astype(jnp.bfloat16), w_ref[...],
                preferred_element_type=jnp.float32) + vec_ref[0:1, :]
    h = _layer_norm(h, vec_ref[1:2, :], vec_ref[2:3, :])
    o_ref[...] = (h + pe_ref[...]).astype(o_ref.dtype)   # dropout = identity (eval)


# -----------------------------------------------------------------------------
# Stage 2: all encoder layers, one program = (batch element b, layer l).
# The (L, D) activation lives in the resident output block across the layer axis.
# -----------------------------------------------------------------------------
def _encoder_layer_kernel(lens_ref,                    # SMEM (B,) int32 scalar prefetch
                          x0_ref,                      # (L, D)  f32  projected input
                          wqkv_ref,                    # (D, 2*H*dk + H*dv) bf16 fused QKV
                          bqkv_ref,                    # (1, 2*H*dk + H*dv) f32
                          wo_ref,                      # (H*dv, D) bf16 output projection
                          dvec_ref,                    # (6, D) f32  bo, g1, be1, b2, g2, be2
                          w1_ref,                      # (D, d_inner) bf16
                          b1_ref,                      # (1, d_inner) f32
                          w2_ref,                      # (d_inner, D) bf16
                          o_ref,                       # (L, D) f32  VMEM-resident activation
                          qkv_scr,                     # (L, 2*H*dk + H*dv) bf16 scratch
                          *, n_head, d_k, d_v, tq):
    H = n_head
    L, D = o_ref.shape
    b = pl.program_id(0)
    layer = pl.program_id(1)
    seq_len = lens_ref[b]

    # ---- layer-0 prologue: load the projected input into the resident block --
    @pl.when(layer == 0)
    def _():
        o_ref[...] = x0_ref[...]

    # ---- fused QKV projection: ONE lane-dense (L,D) x (D, 2H*dk+H*dv) matmul --
    xb = o_ref[...].astype(jnp.bfloat16)
    qkv = jnp.dot(xb, wqkv_ref[...], preferred_element_type=jnp.float32) + bqkv_ref[...]
    qkv_scr[...] = qkv.astype(jnp.bfloat16)

    koff = H * d_k
    voff = 2 * H * d_k
    # head-major K / V built from static lane slices (XLU work, no big reshape)
    k = jnp.stack([qkv_scr[:, koff + h * d_k: koff + (h + 1) * d_k]
                   for h in range(H)], axis=0)                           # (H, L, dk)
    v = jnp.stack([qkv_scr[:, voff + h * d_v: voff + (h + 1) * d_v]
                   for h in range(H)], axis=0)                           # (H, L, dv)

    scale = 1.0 / (float(d_k) ** 0.5)                                    # temperature sqrt(d_k)
    key_valid = jax.lax.broadcasted_iota(jnp.int32, (1, 1, L), 2) < seq_len

    bo, g1, be1 = dvec_ref[0:1, :], dvec_ref[1:2, :], dvec_ref[2:3, :]
    b2, g2, be2 = dvec_ref[3:4, :], dvec_ref[4:5, :], dvec_ref[5:6, :]

    n_q = L // tq

    @pl.loop(0, n_q)
    def _q_block(qb):
        start = pl.multiple_of(qb * tq, tq)

        @pl.when(start < seq_len)                       # skip fully padded q blocks
        def _():
            q_blk = jnp.stack(
                [qkv_scr[pl.ds(start, tq), h * d_k:(h + 1) * d_k] for h in range(H)],
                axis=0)                                                  # (H, tq, dk)
            x_blk = o_ref[pl.ds(start, tq), :]          # residual: layer-input rows (not yet overwritten)
            row = start + jax.lax.broadcasted_iota(jnp.int32, (tq, 1), 0)
            non_pad = (row < seq_len).astype(jnp.float32)                # (tq, 1)

            # ---- attention for this q block: only (H, tq, L) scores live ----
            s = jnp.einsum('htk,hmk->htm', q_blk, k,
                           preferred_element_type=jnp.float32) * scale
            s = jnp.where(key_valid, s, NEG_INF)                         # masked_fill (finite)
            m = jnp.max(s, axis=-1, keepdims=True)
            e = jnp.exp(s - m)
            p = (e * pl.reciprocal(jnp.sum(e, axis=-1, keepdims=True),
                                   approx=True)).astype(jnp.bfloat16)
            ctx = jnp.einsum('htm,hmd->htd', p, v,
                             preferred_element_type=jnp.float32)         # (H, tq, dv)
            # concat heads -> one lane-dense (tq, H*dv) x (H*dv, D) output proj
            ctx_l = jnp.concatenate([ctx[h] for h in range(H)],
                                    axis=-1).astype(jnp.bfloat16)
            attn = jnp.dot(ctx_l, wo_ref[...],
                           preferred_element_type=jnp.float32) + bo
            attn = _layer_norm(attn + x_blk, g1, be1) * non_pad          # enc_output *= non_pad

            # ---- position-wise feed-forward (row-wise, same q block) --------
            hid = jnp.dot(attn.astype(jnp.bfloat16), w1_ref[...],
                          preferred_element_type=jnp.float32) + b1_ref[...]
            hid = jnp.maximum(hid, 0.0)                                  # ReLU
            ff = jnp.dot(hid.astype(jnp.bfloat16), w2_ref[...],
                         preferred_element_type=jnp.float32) + b2
            out_blk = _layer_norm(ff + attn, g2, be2) * non_pad
            o_ref[pl.ds(start, tq), :] = out_blk.astype(o_ref.dtype)

        @pl.when(start >= seq_len)                      # padded block: just zero (== *non_pad)
        def _():
            o_ref[pl.ds(start, tq), :] = jnp.zeros((tq, D), o_ref.dtype)


# -----------------------------------------------------------------------------
# Wrapper
# -----------------------------------------------------------------------------
def _pick_q_tile(L, q_block):
    """largest multiple-of-8 divisor of L that is <= q_block, else L."""
    tq = L
    cand = min(q_block, L)
    cand -= cand % 8
    while cand >= 8:
        if L % cand == 0:
            tq = cand
            break
        cand -= 8
    return tq


def _vmem_limit_bytes(L, tq, D, H, d_k, d_v, d_inner):
    f32, b16 = 4, 2
    qkv_dim = 2 * H * d_k + H * d_v
    io = 4 * L * D * f32                                        # x0 + out block, double-buffered
    wts = 2 * b16 * (D * qkv_dim + H * d_v * D + D * d_inner + d_inner * D)
    smalls = 2 * f32 * (qkv_dim + 6 * D + d_inner)
    scr = L * qkv_dim * b16                                     # qkv scratch
    vals = L * D * b16 + L * qkv_dim * f32 + 2 * L * H * d_k * b16
    blk = (H * tq * L) * (2 * f32 + b16) + H * tq * d_v * f32 \
        + tq * H * d_v * b16 + 3 * tq * D * f32 + tq * d_inner * (f32 + b16)
    est = int((io + wts + smalls + scr + vals + blk) * 1.5) + (8 << 20)
    try:
        cap = int(getattr(pltpu.get_tpu_info(), "vmem_capacity_bytes", 64 << 20))
    except Exception:
        cap = 64 << 20
    return max(32 << 20, min(est, int(cap * 9 // 10)))


def encoder_forward(padded_input, input_lengths, params, *, n_head, d_k, d_v,
                    q_block=128):
    B, L, d_input = padded_input.shape
    D = params["w_in"].shape[1]
    d_inner = params["w1"].shape[2]
    n_layers = params["wqkv"].shape[0]
    H = n_head
    qkv_dim = 2 * H * d_k + H * d_v

    pe = positional_encoding(L, D)
    lens = input_lengths.astype(jnp.int32)
    tq = _pick_q_tile(L, q_block)

    # ---- stage 1: linear_in + layer_norm_in + positional encoding ------------
    x0 = pl.pallas_call(
        _input_proj_kernel,
        out_shape=jax.ShapeDtypeStruct((B, L, D), jnp.float32),
        grid=(B,),
        in_specs=[
            pl.BlockSpec((None, L, d_input), lambda b: (b, 0, 0)),
            pl.BlockSpec((L, D), lambda b: (0, 0)),
            pl.BlockSpec((d_input, D), lambda b: (0, 0)),
            pl.BlockSpec((3, D), lambda b: (0, 0)),
        ],
        out_specs=pl.BlockSpec((None, L, D), lambda b: (b, 0, 0)),
        compiler_params=pltpu.CompilerParams(dimension_semantics=("parallel",)),
    )(padded_input, pe, params["w_in"], params["invec"])

    # ---- stage 2: all encoder layers ------------------------------------------
    kernel = functools.partial(_encoder_layer_kernel,
                               n_head=H, d_k=d_k, d_v=d_v, tq=tq)

    def per_layer(shape):    # stacked per-layer input, indexed by the layer axis
        return pl.BlockSpec((None,) + shape,
                            lambda b, l, lens_ref: (l,) + (0,) * len(shape))

    grid_spec = pltpu.PrefetchScalarGridSpec(
        num_scalar_prefetch=1,
        grid=(B, n_layers),                       # b outer (parallel), layer inner (arbitrary)
        in_specs=[
            pl.BlockSpec((None, L, D), lambda b, l, lens_ref: (b, 0, 0)),   # x0
            per_layer((D, qkv_dim)),              # fused QKV weight
            per_layer((1, qkv_dim)),              # fused QKV bias
            per_layer((H * d_v, D)),              # output projection
            per_layer((6, D)),                    # bo, g1, be1, b2, g2, be2
            per_layer((D, d_inner)),              # w1
            per_layer((1, d_inner)),              # b1
            per_layer((d_inner, D)),              # w2
        ],
        out_specs=pl.BlockSpec((None, L, D), lambda b, l, lens_ref: (b, 0, 0)),
        scratch_shapes=[pltpu.VMEM((L, qkv_dim), jnp.bfloat16)],
    )

    out = pl.pallas_call(
        kernel,
        out_shape=jax.ShapeDtypeStruct((B, L, D), jnp.float32),
        grid_spec=grid_spec,
        compiler_params=pltpu.CompilerParams(
            dimension_semantics=("parallel", "arbitrary"),
            vmem_limit_bytes=_vmem_limit_bytes(L, tq, D, H, d_k, d_v, d_inner)),
    )(lens, x0,
      params["wqkv"], params["bqkv"], params["wo"], params["dvec"],
      params["w1"], params["b1"], params["w2"])
    return (out,)


# -----------------------------------------------------------------------------
# Params / positional encoding / pure-JAX reference
# -----------------------------------------------------------------------------
def positional_encoding(length, d_model):
    pos = jnp.arange(length, dtype=jnp.float32)[:, None]
    i = jnp.arange(d_model)[None, :]
    angle = pos / jnp.power(10000.0, (2.0 * (i // 2)).astype(jnp.float32) / d_model)
    return jnp.where(i % 2 == 0, jnp.sin(angle), jnp.cos(angle)).astype(jnp.float32)


def init_encoder_params(key, d_input, d_model, d_inner, n_head, d_k, d_v, n_layers,
                        scale=0.05):
    H = n_head
    keys = jax.random.split(key, 2 + n_layers)
    w_in = scale * jax.random.normal(keys[0], (d_input, d_model), jnp.float32)
    b_in = scale * jax.random.normal(keys[1], (d_model,), jnp.float32)
    invec = jnp.stack([b_in, jnp.ones((d_model,)), jnp.zeros((d_model,))])

    wqkv, bqkv, wo, dvec, w1, b1, w2 = [], [], [], [], [], [], []
    for lkey in keys[2:]:
        ks = jax.random.split(lkey, 10)
        wq = scale * jax.random.normal(ks[0], (H, d_model, d_k), jnp.float32)
        wk = scale * jax.random.normal(ks[1], (H, d_model, d_k), jnp.float32)
        wv = scale * jax.random.normal(ks[2], (H, d_model, d_v), jnp.float32)
        # pack q/k/v head-major along the output dim -> one (D, 2H*dk+H*dv) matmul
        wqkv.append(jnp.concatenate(
            [wq.transpose(1, 0, 2).reshape(d_model, H * d_k),
             wk.transpose(1, 0, 2).reshape(d_model, H * d_k),
             wv.transpose(1, 0, 2).reshape(d_model, H * d_v)], axis=1))
        bq = scale * jax.random.normal(ks[3], (H, d_k), jnp.float32)
        bk = scale * jax.random.normal(ks[4], (H, d_k), jnp.float32)
        bv = scale * jax.random.normal(ks[5], (H, d_v), jnp.float32)
        bqkv.append(jnp.concatenate(
            [bq.reshape(1, H * d_k), bk.reshape(1, H * d_k),
             bv.reshape(1, H * d_v)], axis=1))
        wo_h = scale * jax.random.normal(ks[6], (H, d_v, d_model), jnp.float32)
        wo.append(wo_h.reshape(H * d_v, d_model))              # head-major (H*dv, D)
        bo = scale * jax.random.normal(ks[7], (d_model,), jnp.float32)
        w1.append(scale * jax.random.normal(ks[8], (d_model, d_inner), jnp.float32))
        b1.append(scale * jax.random.normal(ks[9], (1, d_inner), jnp.float32))
        w2.append(scale * jax.random.normal(jax.random.fold_in(lkey, 123),
                                            (d_inner, d_model), jnp.float32))
        b2 = scale * jax.random.normal(jax.random.fold_in(lkey, 456),
                                       (d_model,), jnp.float32)
        dvec.append(jnp.stack([bo, jnp.ones((d_model,)), jnp.zeros((d_model,)),
                               b2, jnp.ones((d_model,)), jnp.zeros((d_model,))]))

    return {
        "w_in": w_in.astype(jnp.bfloat16),
        "invec": invec.astype(jnp.float32),
        "wqkv": jnp.stack(wqkv).astype(jnp.bfloat16),   # (n_layers, D, 2H*dk+H*dv)
        "bqkv": jnp.stack(bqkv).astype(jnp.float32),    # (n_layers, 1, 2H*dk+H*dv)
        "wo": jnp.stack(wo).astype(jnp.bfloat16),       # (n_layers, H*dv, D)
        "dvec": jnp.stack(dvec).astype(jnp.float32),    # (n_layers, 6, D)
        "w1": jnp.stack(w1).astype(jnp.bfloat16),
        "b1": jnp.stack(b1).astype(jnp.float32),
        "w2": jnp.stack(w2).astype(jnp.bfloat16),
    }


def encoder_reference(padded_input, input_lengths, params, *, n_head, d_k, d_v):
    """Pure-JAX reference mirroring the kernel's bf16-operand / f32-accum math."""
    H = n_head
    B, L, _ = padded_input.shape
    D = params["w_in"].shape[1]
    n_layers = params["wqkv"].shape[0]
    bf16, f32 = jnp.bfloat16, jnp.float32
    pe = positional_encoding(L, D)
    valid = jnp.arange(L)[None, :] < input_lengths[:, None]
    npm = valid[:, :, None].astype(f32)

    def ln(x, g, b_):
        mu = x.mean(-1, keepdims=True)
        var = ((x - mu) ** 2).mean(-1, keepdims=True)
        return (x - mu) / jnp.sqrt(var + LN_EPS) * g + b_

    x = jnp.einsum('bld,de->ble', padded_input.astype(bf16), params["w_in"],
                   preferred_element_type=f32) + params["invec"][0]
    x = ln(x, params["invec"][1], params["invec"][2]) + pe[None]

    for l in range(n_layers):
        wqkv, bqkv = params["wqkv"][l], params["bqkv"][l]
        wo, dv_ = params["wo"][l], params["dvec"][l]
        w1, b1, w2 = params["w1"][l], params["b1"][l], params["w2"][l]

        xb = x.astype(bf16)
        qkv = jnp.einsum('bld,de->ble', xb, wqkv, preferred_element_type=f32) + bqkv
        q = qkv[..., 0:H * d_k].reshape(B, L, H, d_k)
        k = qkv[..., H * d_k:2 * H * d_k].reshape(B, L, H, d_k)
        v = qkv[..., 2 * H * d_k:].reshape(B, L, H, d_v)
        s = jnp.einsum('blhk,bmhk->bhlm', q.astype(bf16), k.astype(bf16),
                       preferred_element_type=f32) / jnp.sqrt(float(d_k))
        s = jnp.where(valid[:, None, None, :], s, NEG_INF)
        p = jax.nn.softmax(s, axis=-1)
        ctx = jnp.einsum('bhlm,bmhd->blhd', p.astype(bf16), v.astype(bf16),
                         preferred_element_type=f32)
        attn = jnp.einsum('blf,fe->ble',
                          ctx.reshape(B, L, H * d_v).astype(bf16), wo,
                          preferred_element_type=f32) + dv_[0]
        attn = ln(attn + x, dv_[1], dv_[2]) * npm
        hid = jnp.maximum(jnp.einsum('ble,ei->bli', attn.astype(bf16), w1,
                                     preferred_element_type=f32) + b1, 0.0)
        ff = jnp.einsum('bli,ie->ble', hid.astype(bf16), w2,
                        preferred_element_type=f32) + dv_[3]
        x = ln(ff + attn, dv_[4], dv_[5]) * npm
    return x


if __name__ == "__main__":
    # Small shapes consistent with the module's B x L x d_input convention.
    # L=16 with q_block=8 exercises the q-tiled path (2 blocks, one fully padded
    # for the second sequence).
    B, L = 2, 16
    d_input, d_model, d_inner = 16, 32, 64
    n_head, d_k, d_v, n_layers = 4, 8, 8, 2

    key = jax.random.PRNGKey(0)
    k_x, k_p = jax.random.split(key)
    padded_input = jax.random.normal(k_x, (B, L, d_input), jnp.float32)
    input_lengths = jnp.array([L, 5], dtype=jnp.int32)

    params = init_encoder_params(k_p, d_input, d_model, d_inner,
                                 n_head, d_k, d_v, n_layers)

    (enc_output,) = encoder_forward(padded_input, input_lengths, params,
                                    n_head=n_head, d_k=d_k, d_v=d_v, q_block=8)
    enc_output = jax.block_until_ready(enc_output)

    assert enc_output.shape == (B, L, d_model)
    assert bool(jnp.all(jnp.isfinite(enc_output)))
    # padded positions of sequence 1 must be zeroed by the non-pad mask
    assert bool(jnp.all(enc_output[1, 5:, :] == 0.0))

    # validate against a pure-JAX reference using the same packed params
    ref = encoder_reference(padded_input, input_lengths, params,
                            n_head=n_head, d_k=d_k, d_v=d_v)
    err = float(jnp.max(jnp.abs(enc_output - ref)))
    assert err < 5e-2, f"max abs error vs reference: {err}"

    print("KERNEL_OK")
</pallas_src>

<mosaic_0001>
module attributes {stable_mosaic.version = 11 : i64} {
  func.func @_input_proj_kernel(%arg0: i32, %arg1: memref<1x16x16xf32, #tpu.memory_space<vmem>>, %arg2: memref<16x32xf32, #tpu.memory_space<vmem>>, %arg3: memref<16x32xbf16, #tpu.memory_space<vmem>>, %arg4: memref<3x32xf32, #tpu.memory_space<vmem>>, %arg5: memref<1x16x32xf32, #tpu.memory_space<vmem>>) attributes {dimension_semantics = [#tpu.dimension_semantics<parallel>], iteration_bounds = array<i64: 2>, scalar_prefetch = 0 : i64, scratch_operands = 0 : i64, tpu.core_type = #tpu.core_type<tc>, window_params = [{transform_indices = @transform_0, window_bounds = array<i64: 1, 16, 16>}, {pipeline_mode = #tpu.pipeline_mode<synchronous>, transform_indices = @transform_1, window_bounds = array<i64: 16, 32>}, {pipeline_mode = #tpu.pipeline_mode<synchronous>, transform_indices = @transform_2, window_bounds = array<i64: 16, 32>}, {pipeline_mode = #tpu.pipeline_mode<synchronous>, transform_indices = @transform_3, window_bounds = array<i64: 3, 32>}, {transform_indices = @transform_4, window_bounds = array<i64: 1, 16, 32>}]} {
    %c0 = arith.constant 0 : index
    %c0_0 = arith.constant 0 : index
    %c0_1 = arith.constant 0 : index
    %0 = vector.load %arg1[%c0, %c0_0, %c0_1] : memref<1x16x16xf32, #tpu.memory_space<vmem>>, vector<1x16x16xf32>
    %1 = vector.shape_cast %0 : vector<1x16x16xf32> to vector<16x16xf32>
    %2 = arith.truncf %1 : vector<16x16xf32> to vector<16x16xbf16>
    %c0_2 = arith.constant 0 : index
    %c0_3 = arith.constant 0 : index
    %3 = vector.load %arg3[%c0_2, %c0_3] : memref<16x32xbf16, #tpu.memory_space<vmem>>, vector<16x32xbf16>
    %cst = arith.constant dense<0.000000e+00> : vector<16x32xf32>
    %4 = tpu.matmul %2, %3, %cst {dimension_numbers = #tpu.dot_dimension_numbers<[1], [0], [0], [1], [0, 0, 1, 1], [], []>} : vector<16x16xbf16>, vector<16x32xbf16>, vector<16x32xf32> -> vector<16x32xf32>
    %c0_4 = arith.constant 0 : index
    %c0_5 = arith.constant 0 : index
    %5 = vector.load %arg4[%c0_4, %c0_5] : memref<3x32xf32, #tpu.memory_space<vmem>>, vector<1x32xf32>
    %6 = vector.broadcast %5 : vector<1x32xf32> to vector<16x32xf32>
    %7 = arith.addf %4, %6 : vector<16x32xf32>
    %c1 = arith.constant 1 : index
    %c0_6 = arith.constant 0 : index
    %8 = vector.load %arg4[%c1, %c0_6] : memref<3x32xf32, #tpu.memory_space<vmem>>, vector<1x32xf32>
    %c2 = arith.constant 2 : index
    %c0_7 = arith.constant 0 : index
    %9 = vector.load %arg4[%c2, %c0_7] : memref<3x32xf32, #tpu.memory_space<vmem>>, vector<1x32xf32>
    %cst_8 = arith.constant dense<0.000000e+00> : vector<16xf32>
    %10 = vector.multi_reduction <add>, %7, %cst_8 [1] : vector<16x32xf32> to vector<16xf32>
    %11 = vector.shape_cast %10 : vector<16xf32> to vector<16x1xf32>
    %cst_9 = arith.constant 3.200000e+01 : f32
    %12 = vector.broadcast %cst_9 : f32 to vector<16x1xf32>
    %13 = arith.divf %11, %12 : vector<16x1xf32>
    %14 = arith.mulf %7, %7 : vector<16x32xf32>
    %cst_10 = arith.constant dense<0.000000e+00> : vector<16xf32>
    %15 = vector.multi_reduction <add>, %14, %cst_10 [1] : vector<16x32xf32> to vector<16xf32>
    %16 = vector.shape_cast %15 : vector<16xf32> to vector<16x1xf32>
    %cst_11 = arith.constant 3.200000e+01 : f32
    %17 = vector.broadcast %cst_11 : f32 to vector<16x1xf32>
    %18 = arith.divf %16, %17 : vector<16x1xf32>
    %19 = arith.mulf %13, %13 : vector<16x1xf32>
    %20 = arith.subf %18, %19 : vector<16x1xf32>
    %cst_12 = arith.constant 0.000000e+00 : f32
    %21 = vector.broadcast %cst_12 : f32 to vector<16x1xf32>
    %22 = arith.maximumf %20, %21 : vector<16x1xf32>
    %23 = vector.broadcast %13 : vector<16x1xf32> to vector<16x32xf32>
    %24 = arith.subf %7, %23 : vector<16x32xf32>
    %cst_13 = arith.constant 9.99999974E-6 : f32
    %25 = vector.broadcast %cst_13 : f32 to vector<16x1xf32>
    %26 = arith.addf %22, %25 : vector<16x1xf32>
    %27 = math.rsqrt %26 : vector<16x1xf32>
    %28 = vector.broadcast %27 : vector<16x1xf32> to vector<16x32xf32>
    %29 = arith.mulf %24, %28 : vector<16x32xf32>
    %30 = vector.broadcast %8 : vector<1x32xf32> to vector<16x32xf32>
    %31 = arith.mulf %29, %30 : vector<16x32xf32>
    %32 = vector.broadcast %9 : vector<1x32xf32> to vector<16x32xf32>
    %33 = arith.addf %31, %32 : vector<16x32xf32>
    %c0_14 = arith.constant 0 : index
    %c0_15 = arith.constant 0 : index
    %34 = vector.load %arg2[%c0_14, %c0_15] : memref<16x32xf32, #tpu.memory_space<vmem>>, vector<16x32xf32>
    %35 = arith.addf %33, %34 : vector<16x32xf32>
    %c0_16 = arith.constant 0 : index
    %c0_17 = arith.constant 0 : index
    %c0_18 = arith.constant 0 : index
    %36 = vector.load %arg5[%c0_16, %c0_17, %c0_18] : memref<1x16x32xf32, #tpu.memory_space<vmem>>, vector<1x16x32xf32>
    %37 = vector.shape_cast %36 : vector<1x16x32xf32> to vector<16x32xf32>
    %38 = vector.shape_cast %35 : vector<16x32xf32> to vector<1x16x32xf32>
    tpu.vector_store %arg5[%c0_16, %c0_17, %c0_18], %38 {strides = array<i32>} : memref<1x16x32xf32, #tpu.memory_space<vmem>>, vector<1x16x32xf32>,
    return
  }
  func.func @transform_0(%arg0: i32) -> (i32, i32, i32) {
    %c0_i32 = arith.constant 0 : i32
    %c0_i32_0 = arith.constant 0 : i32
    %c0_i32_1 = arith.constant 0 : i32
    return %arg0, %c0_i32, %c0_i32_0 : i32, i32, i32
  }
  func.func @transform_1(%arg0: i32) -> (i32, i32) {
    %c0_i32 = arith.constant 0 : i32
    %c0_i32_0 = arith.constant 0 : i32
    %c0_i32_1 = arith.constant 0 : i32
    return %c0_i32, %c0_i32_0 : i32, i32
  }
  func.func @transform_2(%arg0: i32) -> (i32, i32) {
    %c0_i32 = arith.constant 0 : i32
    %c0_i32_0 = arith.constant 0 : i32
    %c0_i32_1 = arith.constant 0 : i32
    return %c0_i32, %c0_i32_0 : i32, i32
  }
  func.func @transform_3(%arg0: i32) -> (i32, i32) {
    %c0_i32 = arith.constant 0 : i32
    %c0_i32_0 = arith.constant 0 : i32
    %c0_i32_1 = arith.constant 0 : i32
    return %c0_i32, %c0_i32_0 : i32, i32
  }
  func.func @transform_4(%arg0: i32) -> (i32, i32, i32) {
    %c0_i32 = arith.constant 0 : i32
    %c0_i32_0 = arith.constant 0 : i32
    %c0_i32_1 = arith.constant 0 : i32
    return %arg0, %c0_i32, %c0_i32_0 : i32, i32, i32
  }
}

</mosaic_0001>

<bundles_post_ra>
// kernel: tpu_custom_call.1
= control target key start
LH: loop header
LB: loop body
LE: loop exit
PB: predicated region body
PF: predicated region fallthrough
CT: control target
= control target key end

     0   :  { %9 = vsyncpa [#allocation3], 0  ;;  %s1020_s0 = inlined_call_operand.hbm [shape: f32[2,16,16], index: 0, kind: input, shape index: {}]   ;;  %s1021_s1 = inlined_call_operand.hbm [shape: f32[16,32], index: 1, kind: input, shape index: {}]   ;;  %s1022_s2 = inlined_call_operand.hbm [shape: bf16[16,32], index: 2, kind: input, shape index: {}]   ;;  %s1023_s3 = inlined_call_operand.hbm [shape: f32[3,32], index: 3, kind: input, shape index: {}]   ;;  %s1024_s4 = inlined_call_operand.hbm [shape: f32[2,16,32], index: 4, kind: output, shape index: {}]  }
   0x1   :  { %11 = vsyncpa [#allocation3 + $0x1], 0 }
   0x2   :  { %12 = vsyncpa [#allocation6], 0 }
   0x3   :  { %13 = vsyncpa [#allocation9], 0 }
   0x4   :  { %14 = vsyncpa [#allocation4], 0 }
   0x5   :  { %16 = vsyncpa [#allocation4 + $0x1], 0  ;;  %s840_s15 = smov 0   ;;  %s842_s16 = smov 0  }
   0x6   :  { %s844_s17 = smov 0   ;;  %s846_s18 = smov 0  }
   0x7 LB: > { %s861_s19 = sadd.s32 4294967295, %s803_s18   ;;  %s488_s20 = sadd.s32 4294967294, %s803_s18   ;;  %s803_s18 = sphi %s846_s18, %s1035_s18   ;;  %s799_s17 = sphi %s844_s17, %s1034_s17   ;;  %s795_s16 = sphi %s842_s16, %s1033_s16   ;;  %s791_s15 = sphi %s840_s15, %s1032_s15  }
   0x8   : > { %p42_p0 = scmp.ne.s32.totalorder %s795_s16, %s791_s15  ;;  %p43_p1 = scmp.eq.s32.totalorder %s861_s19, 0 }
   0x9   : > { %p129_p2 = scmp.eq.s32.totalorder %s861_s19, 1  ;;  %p135_p3 = scmp.eq.s32.totalorder %s488_s20, 1 }
   0xa   : > { %p870_p4 = por %p43_p1, %p42_p0  ;;  %p489_p5 = scmp.ge.s32.totalorder %s803_s18, 1 }
   0xb   : > { %p875_p6 = por %p135_p3, %p42_p0  ;;  %p142_p7 = scmp.lt.s32.totalorder %s803_s18, 3 }
   0xc   : > { %s153_s25 = sshll.u32 %s1021_s1, 4  ;;  %s805_s27 = smov [#allocation5]   ;;  %s154_s25 = int_to_ptr.hbm [resolvable:$true] %s153_s25 }
   0xd   : > { %p883_p8 = pnand %p489_p5, %p142_p7  ;;  %s155_s28 = sshll.u32 %s805_s27, 4  ;;  %s156_s28 = int_to_ptr.vmem [resolvable:$true] %s155_s28 }
   0xe   : > { %s167_s6 = sshll.u32 %s1022_s2, 4  ;;  %s806_s7 = smov 128   ;;  %s168_s6 = int_to_ptr.hbm [resolvable:$true] %s167_s6 }
   0xf   : > { %p532_p9 = pneg %p883_p8  ;;  %s807_s8 = smov 8  }
  0x10   : > { %s808_s9 = smov [#allocation7]   ;;  %s809_s11 = smov 64  }
  0x11   : > { %p891_p10 = pnand %p532_p9, %p43_p1  ;;  %s169_s10 = sshll.u32 %s808_s9, 4  ;;  %s170_s10 = int_to_ptr.vmem [resolvable:$true] %s169_s10 }
  0x12   : > { %s810_s12 = smov 4   ;;  %s182_s20 = sshll.u32 %s1023_s3, 4  ;;  %s183_s20 = int_to_ptr.hbm [resolvable:$true] %s182_s20 }
  0x13   : > { %535 = dma.hbm_to_vmem [thread:$0]  (!%p891_p10), %s154_s25, 256, %s156_s28, [#allocation6], %s806_s7, %s806_s7, %s807_s8  }
  0x14   : > { %538 = dma.hbm_to_vmem [thread:$0]  (!%p891_p10), %s168_s6, 128, %s170_s10, [#allocation6], %s809_s11, %s809_s11, %s810_s12  }
  0x15   : > { %s811_s23 = smov [#allocation8]   ;;  %s912_s25 = sadd.s32 1, %s803_s18  }
  0x16   : > { %s184_s24 = sshll.u32 %s811_s23, 4  ;;  %s26_s27 = ssub.s32 %s803_s18, %s912_s25  ;;  %s185_s24 = int_to_ptr.vmem [resolvable:$true] %s184_s24 }
  0x17   : > { %541 = dma.hbm_to_vmem [thread:$0]  (!%p891_p10), %s183_s20, 64, %s185_s24, [#allocation9]  }
  0x18   : > { %s29_s28 = sadd.s32 1, %s799_s17  ;;  %p27_p12 = scmp.eq.s32.totalorder %s26_s27, 0 }
  0x19   : > { %p36_p13 = scmp.ne.s32.totalorder %s799_s17, %s795_s16  ;;  %p37_p0 = scmp.eq.s32.totalorder %s803_s18, 0 }
  0x1a   : > { %s921_s30 = scalar_select %p27_p12, %s799_s17, %s29_s28  }
  0x1b   : > { %p925_p3 = por %p129_p2, %p36_p13  ;;  %p553_p5 = scmp.lt.s32.totalorder %s803_s18, 2 }
  0x1c   : > { %s195_s6 = sand.u32 1, %s799_s17   ;;  %s513_s9 = sshll.u32 %s803_s18, 4 }
  0x1d   : > { %p38_p7 = por %p37_p0, %p36_p13  ;;  %s494_s29 = sshll.u32 %s195_s6, 4 }
  0x1e   : > { %s204_s12 = scalar_lea.hbm %s1020_s0, %s513_s9  ;;  %s199_s14 = scalar_lea.vmem [#allocation2], %s494_s29 }
  0x1f   : > { %s205_s13 = sshll.u32 %s204_s12, 4  ;;  %s207_s20 = sshll.u32 %s199_s14, 4  ;;  %s206_s13 = int_to_ptr.hbm [resolvable:$true] %s205_s13  ;;  %s208_s20 = int_to_ptr.vmem [resolvable:$true] %s207_s20 }
  0x20   : > { %p935_p9 = pnand %p553_p5, %p38_p7  ;;  %s196_s24 = scalar_lea.sflag [#allocation3], %s195_s6 }
  0x21   : > { %s699_s27 = sshra.s32 %s206_s13, 4  ;;  %s706_s29 = scalar_lea.hbm %s1020_s0, 32  ;;  %s700_s27 = int_to_ptr.hbm [resolvable:$true] %s699_s27 }
  0x22   : > { %s701_s28 = scalar_lea.hbm %s700_s27, 16  ;;  %p703_p10 = pneg %p935_p9 }
  0x23   : > { %p702_p2 = scmp.ne.s32.totalorder %s700_s27, %s701_s28  ;;  %p707_p0 = scmp.lt.s32.totalorder %s700_s27, %s1020_s0 }
  0x24   : > { %p708_p5 = scmp.lt.s32.totalorder %s706_s29, %s701_s28 }
  0x25   : > { %p704_p12 = pnand %p703_p10, %p702_p2 }
  0x26   : > { %p709_p7 = por %p708_p5, %p707_p0 }
  0x27   : > { %p705_p13 = pneg %p704_p12 }
  0x29   : > { %p710_p11 = pnand %p709_p7, %p705_p13 }
  0x2b   : > { %713 = shalt.err (!%p710_p11)
}
  0x2c   : > { %545 = dma.hbm_to_vmem [thread:$0]  (!%p935_p9), %s206_s13, 256, %s208_s20, %s196_s24, %s806_s7, %s806_s7, %s807_s8  }
  0x2d   : > { %219 = sbr.rel (%p883_p8) target bundleno = 352 (0x160), region = 36  ;;  %s955_s6 = sand.u32 (!%p883_p8), 1, %s795_s16  }
  0x2e   : > { %s498_s14 = sshll.u32 (!%p883_p8), %s955_s6, 4  ;;  %s222_s27 = scalar_lea.sflag (!%p883_p8), [#allocation3], %s955_s6 }
  0x2f   : > { %s225_s28 = scalar_lea.vmem (!%p883_p8), [#allocation2], %s498_s14 }
  0x32   : > { %774 = dma.done.wait (%p870_p4), %s222_s27, 256  }
  0x33   : > { %776 = vsyncadd (%p870_p4), %s222_s27, 4294967040 }
  0x34   : > { %778 = dma.done.wait (%p43_p1), [#allocation6], 384  }
  0x35   : > { %780 = vsyncadd (%p43_p1), [#allocation6], 4294966912 }
  0x36   : > { %782 = dma.done.wait (%p43_p1), [#allocation9], 64  }
  0x37   : > { %784 = vsyncadd (%p43_p1), [#allocation9], 4294967232  ;;  %v514_v0 = vld [vmem:[#allocation7] sm:$0xff]  ;;  %v268_v2 = vld [vmem:[%s225_s28 + $0x8] sm:$0xff]  ;;  %vm280_vm0 = vcmask 130048   ;;  %vm300_vm1 = vcmask 261120  }
  0x38   : > { %v267_v1 = vld [vmem:[%s225_s28] sm:$0xff]  ;;  %291 = vmatpush.bf16.msra.mxu0 %v514_v0  ;;  %v600_v4 = vld [vmem:[#allocation8] ss:$0 sm:$0xff]  ;;  %v812_v15 = vmov 32.0   ;;  %v601_v46 = vld [vmem:[#allocation8 + $0x1] ss:$0 sm:$0xff] }
  0x39   : > { %v269_v3 = vpack.c.bf16 %v268_v2, %v267_v1  ;;  %603 = vrcp.f32 %v812_v15  ;;  %v602_v49 = vld [vmem:[#allocation8 + $0x2] ss:$0 sm:$0xff]  ;;  %v364_v54 = vld [vmem:[#allocation5] sm:$0xff]  ;;  %s515_s21 = sshll.u32 %s861_s19, 4  ;;  %s265_s26 = scalar_lea.vmem [#allocation10], %s498_s14  ;;  %v365_v63 = vld [vmem:[#allocation5 + $0x8] sm:$0xff] }
  0x3a   : > { %s382_s13 = scalar_lea.hbm %s1024_s4, %s515_s21  ;;  %s383_s19 = sshll.u32 %s265_s26, 4  ;;  %s384_s19 = int_to_ptr.vmem [resolvable:$true] %s383_s19 }
  0x3b   : > { %507 = vmatmul.msk.bf16.vlgmr.msra.gmra.mxu0 %vm280_vm0, %v269_v3  ;;  %s385_s20 = sshll.u32 %s382_s13, 4  ;;  %s371_s23 = scalar_lea.sflag [#allocation4], %s955_s6  ;;  %s386_s20 = int_to_ptr.hbm [resolvable:$true] %s385_s20 }
  0x3c   : > { %s743_s24 = sshra.s32 %s386_s20, 4  ;;  %s749_s11 = scalar_lea.hbm %s1024_s4, 32  ;;  %s744_s24 = int_to_ptr.hbm [resolvable:$true] %s743_s24 }
  0x3d   : > { %s745_s9 = scalar_lea.hbm %s744_s24, 16  ;;  %p750_p11 = scmp.lt.s32.totalorder %s744_s24, %s1024_s4 }
  0x3e   : > { %p746_p1 = scmp.ne.s32.totalorder %s744_s24, %s745_s9  ;;  %p751_p9 = scmp.lt.s32.totalorder %s749_s11, %s745_s9 }
  0x3f   : > { %v604_v16 = vpop.eup %603 }
  0x40   : > { %v308_v17 = vmul.f32 32.0, %v604_v16  ;;  %vm312_vm2 = vweird.f32 %v604_v16  ;;  %p747_p4 = pnand %p746_p1, %p925_p3  ;;  %p752_p2 = por %p751_p9, %p750_p11 }
  0x42   : > { %v309_v18 = vsub.f32 1.0, %v308_v17  ;;  %p748_p8 = pneg %p747_p4 }
  0x44   : > { %v310_v19 = vmul.f32 %v604_v16, %v309_v18  ;;  %p753_p10 = pnand %p752_p2, %p748_p8 }
  0x46   : > { %v311_v20 = vadd.f32 %v604_v16, %v310_v19 }
  0x48   : > { %v313_v21 = vsel %vm312_vm2, %v604_v16, %v311_v20 }
  0xb8   : > { %v293_v5 = vpop.f32.mrf.mxu0 }
  0xb9   : > { %v294_v6 = vadd.f32 %v600_v4, %v293_v5 }
  0xbb   : > { %v301_v7 = vsel %vm300_vm1, %v294_v6, 0.0  ;;  %v316_v8 = vmul.f32 %v294_v6, %v294_v6 }
  0xbc   : > { %302 = vadd.xlane.f32.xlu0 %v301_v7 }
  0xbd   : > { %v318_v9 = vsel %vm300_vm1, %v316_v8, 0.0 }
  0xbe   : > { %319 = vadd.xlane.f32.xlu1 %v318_v9 }
  0xc0   : > { %v295_v10 = vpop.f32.mrf.mxu0 }
  0xc1   : > { %v975_v11 = vadd.f32 %v600_v4, %v295_v10 }
  0xc3   : > { %v304_v12 = vsel %vm300_vm1, %v975_v11, 0.0  ;;  %v317_v13 = vmul.f32 %v975_v11, %v975_v11 }
  0xc4   : > { %305 = vadd.xlane.f32.xlu0 %v304_v12 }
  0xc5   : > { %v321_v14 = vsel %vm300_vm1, %v317_v13, 0.0 }
  0xc6   : > { %322 = vadd.xlane.f32.xlu1 %v321_v14 }
 0x12f   : > { %v303_v22 = vpop.xlane.xlu0 %302 }
 0x130   : > { %v314_v23 = vmul.f32 %v313_v21, %v303_v22 }
 0x131   : > { %v320_v24 = vpop.xlane.xlu1 %319 }
 0x132   : > { %v326_v25 = vmul.f32 %v314_v23, %v314_v23  ;;  %v324_v26 = vmul.f32 %v320_v24, %v313_v21  ;;  %v332_v45 = vsub.f32 %v294_v6, %v314_v23 }
 0x134   : > { %v328_v27 = vsub.f32 %v324_v26, %v326_v25 }
 0x136   : > { %v330_v28 = vmax.f32 %v328_v27, 0.0 }
 0x137   : > { %v306_v29 = vpop.xlane.xlu0 %305 }
 0x138   : > { %v334_v30 = vadd.f32 1e-05, %v330_v28  ;;  %v315_v31 = vmul.f32 %v313_v21, %v306_v29 }
 0x139   : > { %v323_v32 = vpop.xlane.xlu1 %322 }
 0x13a   : > { %605 = vrsqrt.f32 %v334_v30  ;;  %v327_v33 = vmul.f32 %v315_v31, %v315_v31  ;;  %v325_v34 = vmul.f32 %v323_v32, %v313_v21  ;;  %vm342_vm4 = vweird.f32 %v334_v30 }
 0x13b   : > { %v333_v59 = vsub.f32 %v975_v11, %v315_v31 }
 0x13c   : > { %v329_v35 = vsub.f32 %v325_v34, %v327_v33 }
 0x13e   : > { %v331_v36 = vmax.f32 %v329_v35, 0.0 }
 0x140   : > { %v606_v37 = vpop.eup %605  ;;  %v335_v39 = vadd.f32 1e-05, %v331_v36 }
 0x141   : > { %v337_v38 = vmul.f32 %v606_v37, %v334_v30  ;;  %vm343_vm3 = vweird.f32 %v606_v37 }
 0x142   : > { %607 = vrsqrt.f32 %v335_v39  ;;  %vm344_vm5 = vmor %vm342_vm4, %vm343_vm3  ;;  %vm352_vm7 = vweird.f32 %v335_v39 }
 0x143   : > { %v338_v40 = vmul.f32 %v606_v37, %v337_v38 }
 0x145   : > { %v339_v41 = vmul.f32 0.5, %v338_v40 }
 0x147   : > { %v340_v42 = vsub.f32 1.5, %v339_v41 }
 0x148   : > { %v608_v43 = vpop.eup %607 }
 0x149   : > { %v341_v44 = vmul.f32 %v606_v37, %v340_v42  ;;  %v347_v47 = vmul.f32 %v608_v43, %v335_v39  ;;  %vm353_vm6 = vweird.f32 %v608_v43 }
 0x14a   : > { %vm354_vm8 = vmor %vm352_vm7, %vm353_vm6 }
 0x14b   : > { %v345_v48 = vsel %vm344_vm5, %v606_v37, %v341_v44  ;;  %v348_v51 = vmul.f32 %v608_v43, %v347_v47 }
 0x14c   : > { %v356_v50 = vmul.f32 %v345_v48, %v332_v45 }
 0x14d   : > { %v349_v53 = vmul.f32 0.5, %v348_v51 }
 0x14e   : > { %v359_v52 = vmul.f32 %v601_v46, %v356_v50 }
 0x14f   : > { %v350_v56 = vsub.f32 1.5, %v349_v53 }
 0x150   : > { %v362_v55 = vadd.f32 %v602_v49, %v359_v52 }
 0x151   : > { %v351_v58 = vmul.f32 %v608_v43, %v350_v56 }
 0x152   : > { %v366_v57 = vadd.f32 %v364_v54, %v362_v55 }
 0x153   : > { %v355_v60 = vsel %vm354_vm8, %v608_v43, %v351_v58 }
 0x154   : > { %368 = vst.msk [vmem:[%s265_s26] sm:$0xff] %vm300_vm1, %v366_v57  ;;  %v357_v61 = vmul.f32 %v355_v60, %v333_v59 }
 0x156   : > { %v360_v62 = vmul.f32 %v601_v46, %v357_v61 }
 0x158   : > { %v363_v0 = vadd.f32 %v602_v49, %v360_v62 }
 0x15a   : > { %v367_v1 = vadd.f32 %v365_v63, %v363_v0 }
 0x15c   : > { %369 = vst.msk [vmem:[%s265_s26 + $0x8] sm:$0xff] %vm300_vm1, %v367_v1 }
 0x15d   : > { %756 = shalt.err (!%p753_p10)
}
 0x15e   : > { %s813_s6 = smov 128   ;;  %s814_s27 = smov 8  }
 0x15f   : > { %530 = dma.vmem_to_hbm [thread:$0]  (%p925_p3), %s384_s19, 256, %s386_s20, %s371_s23, %s813_s6, %s813_s6, %s814_s27  }
 0x160 PF: > { %s400_s28 = sand.u32 1, %s791_s15   ;;  %p1031_p12 = scmp.ge.s32.totalorder %s803_s18, 2 }
 0x161   : > { %s401_s21 = scalar_lea.sflag [#allocation4], %s400_s28 }
 0x162   : > { %p547_p13 = pnand %p1031_p12, %p875_p6 }
 0x164   : > { %p548_p0 = pneg %p547_p13 }
 0x166   : > { %786 = dma.done.wait (%p548_p0), %s401_s21, 256  }
 0x167   : > { %788 = vsyncadd (%p548_p0), %s401_s21, 4294967040  ;;  %p19_p5 = scmp.ge.s32.totalorder %s912_s25, 4   ;;  %s1032_s15 = smov %s795_s16 }
 0x168   : > { %s1033_s16 = smov %s799_s17  ;;  %s1034_s17 = smov %s921_s30 }
 0x169   : > { %s1035_s18 = smov %s912_s25  ;;  %21 = sbr.rel (!%p19_p5) target bundleno = 7 (0x7), region = 93 }
 0x16e   :  { %407 = vsyncpa [#allocation3], 1 }
 0x16f   :  { %409 = vsyncpa [#allocation3 + $0x1], 1 }
 0x170   :  { %410 = vsyncpa [#allocation6], 1 }
 0x171   :  { %411 = vsyncpa [#allocation9], 1 }
 0x172   :  { %412 = vsyncpa [#allocation4], 1 }
 0x173   :  { %414 = vsyncpa [#allocation4 + $0x1], 1 }

</bundles_post_ra>
